<compile_context>
chip_gen: v7x
topology: tpu7x:2x2x1
jax: 0.10.0
libtpu: 0.0.40
codegen_flags: <defaults>
</compile_context>

<pallas_src>
import numpy as np
import jax
import jax.numpy as jnp
from jax import lax
from jax.experimental import pallas as pl
from jax.experimental.pallas import tpu as pltpu

# Static problem sizes (from the module definition).
IC, OC, K = 3, 6, 3
H, W = 30, 30
HO, WO = H - K + 1, W - K + 1        # 28, 28   (conv output)
HP, WP = HO // 2, WO // 2            # 14, 14   (pooled output)
FC_OUT = 2
CDIM = K * IC * W                    # 270  stacked conv contraction dim
LDIM = OC * WO                       # 168  channel-stacked lane dim


def dummy_cnn_kernel(x_ref, t_ref, brelu_ref, wfc_ref, bfc_ref, out_ref):
    # x_ref:     (NB, 28, 270) bf16  row-shifted input views, input chans on lanes
    # t_ref:     (270, 168)    bf16  banded (Toeplitz) conv weights
    # brelu_ref: (1, 168)      f32   conv bias per output-channel lane block
    # wfc_ref:   (2, 27, 167)  f32   FC weights folded onto the pre-pool layout
    #                                (nonzero only at even rows / even in-block lanes)
    # bfc_ref:   (1, 2)        f32   FC bias
    # out_ref:   (NB, 1, 2)    f32
    nb = x_ref.shape[0]
    lane = lax.broadcasted_iota(jnp.int32, (1, FC_OUT), 1)       # hoisted broadcast
    for n in range(nb):   # tiny static batch unroll (nb is 1 or a small batch)
        # ---- conv (valid, stride 1): ONE bf16 MXU matmul, f32 accumulation ----
        acc = jnp.dot(x_ref[n], t_ref[...],
                      preferred_element_type=jnp.float32)        # (28, 168)
        y = jnp.maximum(acc + brelu_ref[...], 0.0)               # bias + ReLU

        # ---- 2x2 stride-2 max pool via shifted max (exact, on the VPU) ----
        # Valid pooled values land at (even row, even in-block lane); every other
        # position is multiplied by an exact 0.0 in the folded FC weights below.
        rm = jnp.maximum(y[:-1, :], y[1:, :])                    # (27, 168)
        m = jnp.maximum(rm[:, :-1], rm[:, 1:])                   # (27, 167)

        # ---- fc: elementwise products + full reductions; single (1, 2) store ----
        f0 = jnp.sum(m * wfc_ref[0], axis=(0, 1), keepdims=True)  # (1, 1)
        f1 = jnp.sum(m * wfc_ref[1], axis=(0, 1), keepdims=True)  # (1, 1)
        out_ref[n, :, :] = jnp.where(lane == 0, f0, f1) + bfc_ref[...]


def _num_tensorcores():
    try:
        dev = jax.devices()[0]
        n = getattr(dev, "num_cores", None)
        if n:
            return int(n)
        if "v7" in dev.device_kind.lower():
            return 2
    except Exception:
        pass
    return 1


def _samples_per_block(n):
    """Single-TC chips: fold small batches into one kernel invocation (kills
    per-grid-step pipeline overhead).  Multi-TC chips (v7x): keep the batch on a
    "parallel" grid axis.  Large batches always stay on the grid (static
    unrolling would bloat the kernel and not bound live ranges)."""
    # TODO(synk): on v7x, pick grid=(N,) vs. single-core nb=N by measurement.
    if _num_tensorcores() > 1 or n > 8:
        return 1
    return n


def _repack_weights(wconv, bconv, wfc, bfc, conv_dtype):
    """Host-side weight repacking.  Called ONCE per weight set; keep the returned
    device arrays (via the make_dummy_cnn_forward closure) across forward calls."""
    wconv = np.asarray(wconv, np.float32)
    bconv = np.asarray(bconv, np.float32)
    wfc = np.asarray(wfc, np.float32)
    bfc = np.asarray(bfc, np.float32)

    # Banded (Toeplitz) conv weights, flattened over kernel rows:
    #   T[kh*IC*W + ic*W + j + kw, oc*WO + j] = wconv[oc, ic, kh, kw]
    T = np.zeros((K, IC * W, LDIM), np.float32)
    j = np.arange(WO)
    for kh in range(K):
        for kw in range(K):
            for ic in range(IC):
                for oc in range(OC):
                    T[kh, ic * W + j + kw, oc * WO + j] = wconv[oc, ic, kh, kw]
    T = T.reshape(CDIM, LDIM)

    # Conv bias broadcast to the channel-stacked lane layout: lane oc*28+j <- b[oc].
    brelu = np.repeat(bconv, WO).reshape(1, LDIM)

    # FC weights folded onto the pre-pool channel-stacked layout:
    #   wfc[o, oc*196 + i*14 + jj]  ->  (row 2i, lane oc*28 + 2jj)
    # Every other position (odd rows/lanes, cross-block positions) is exactly 0.0
    # so the shifted-max "garbage" there never leaks into the FC sum.
    wfc_fold = np.zeros((FC_OUT, HO - 1, LDIM - 1), np.float32)
    ii = 2 * np.arange(HP)[:, None]
    jj = 2 * np.arange(WP)[None, :]
    for o in range(FC_OUT):
        w = wfc[o].reshape(OC, HP, WP)
        for oc in range(OC):
            wfc_fold[o, ii, oc * WO + jj] = w[oc]

    return (
        jnp.asarray(T, conv_dtype),
        jnp.asarray(brelu, jnp.float32),
        jnp.asarray(wfc_fold, jnp.float32),
        jnp.asarray(bfc.reshape(1, FC_OUT), jnp.float32),
    )


def make_dummy_cnn_forward(wconv, bconv, wfc, bfc, conv_dtype=jnp.bfloat16):
    """Repack the weights once and return a jitted forward(x), x: (N, 3, 30, 30)."""
    t, brelu, wfc_fold, bfc2 = _repack_weights(wconv, bconv, wfc, bfc, conv_dtype)

    def forward(x):
        n = x.shape[0]
        nb = _samples_per_block(n)
        grid = (n // nb,)

        # Input repack (fused into the jitted graph): input channels stacked on
        # lanes, the K kernel-row shifted views stacked along the contraction dim.
        xcat = jnp.transpose(x.astype(jnp.float32), (0, 2, 1, 3)).reshape(n, H, IC * W)
        x3 = jnp.concatenate([xcat[:, kh:kh + HO, :] for kh in range(K)], axis=-1)
        x3 = x3.astype(conv_dtype)                                 # (N, 28, 270)

        out = pl.pallas_call(
            dummy_cnn_kernel,
            out_shape=jax.ShapeDtypeStruct((n, 1, FC_OUT), jnp.float32),
            grid_spec=pltpu.PrefetchScalarGridSpec(
                num_scalar_prefetch=0,
                grid=grid,
                in_specs=[
                    pl.BlockSpec((nb, HO, CDIM), lambda b: (b, 0, 0)),        # x3
                    pl.BlockSpec((CDIM, LDIM), lambda b: (0, 0)),             # T
                    pl.BlockSpec((1, LDIM), lambda b: (0, 0)),                # brelu
                    pl.BlockSpec((FC_OUT, HO - 1, LDIM - 1),
                                 lambda b: (0, 0, 0)),                        # wfc_fold
                    pl.BlockSpec((1, FC_OUT), lambda b: (0, 0)),              # bfc
                ],
                out_specs=pl.BlockSpec((nb, 1, FC_OUT), lambda b: (b, 0, 0)),
            ),
            compiler_params=pltpu.CompilerParams(
                dimension_semantics=("parallel",)),
        )(x3, t, brelu, wfc_fold, bfc2)
        return out.reshape(n, FC_OUT)

    return jax.jit(forward)


def reference_forward(x, wconv, bconv, wfc, bfc):
    # Pure-JAX reference replicating PyTorch semantics (NCHW, OIHW, f32).
    conv = lax.conv_general_dilated(
        x, wconv, window_strides=(1, 1), padding="VALID",
        dimension_numbers=("NCHW", "OIHW", "NCHW"))
    conv = conv + bconv[None, :, None, None]
    act = jnp.maximum(conv, 0.0)
    pooled = lax.reduce_window(
        act, -jnp.inf, lax.max,
        window_dimensions=(1, 1, 2, 2), window_strides=(1, 1, 2, 2),
        padding="VALID")
    flat = pooled.reshape(x.shape[0], -1)
    return flat @ wfc.T + bfc


if __name__ == "__main__":
    key = jax.random.PRNGKey(0)
    kx, kw1, kb1, kw2, kb2 = jax.random.split(key, 5)

    # Deterministic synthetic parameters (shapes from DummyCNN.__init__).
    x = jax.random.normal(kx, (2, IC, H, W), dtype=jnp.float32)          # (2, 3, 30, 30)
    wconv = 0.1 * jax.random.normal(kw1, (OC, IC, K, K), dtype=jnp.float32)
    bconv = 0.1 * jax.random.normal(kb1, (OC,), dtype=jnp.float32)
    wfc = 0.05 * jax.random.normal(kw2, (FC_OUT, OC * HP * WP), dtype=jnp.float32)
    bfc = 0.1 * jax.random.normal(kb2, (FC_OUT,), dtype=jnp.float32)

    # Repack constants ONCE; repeated calls reuse the device-resident constants
    # and the jit-compiled executable.
    forward = make_dummy_cnn_forward(wconv, bconv, wfc, bfc)
    out = jax.block_until_ready(forward(x))
    out = jax.block_until_ready(forward(x))   # second call: no repack / recompile

    ref = reference_forward(x, wconv, bconv, wfc, bfc)
    # Tolerance budgets for the bf16 conv path (inputs + conv weights in bf16,
    # f32 accumulation); pooling and the FC layer run in f32.
    np.testing.assert_allclose(np.asarray(out), np.asarray(ref), rtol=1e-2, atol=1e-2)

    print("KERNEL_OK")
</pallas_src>

<mosaic_0001>
module attributes {stable_mosaic.version = 11 : i64} {
  func.func @dummy_cnn_kernel(%arg0: i32, %arg1: memref<2x28x270xbf16, #tpu.memory_space<vmem>>, %arg2: memref<270x168xbf16, #tpu.memory_space<vmem>>, %arg3: memref<1x168xf32, #tpu.memory_space<vmem>>, %arg4: memref<2x27x167xf32, #tpu.memory_space<vmem>>, %arg5: memref<1x2xf32, #tpu.memory_space<vmem>>, %arg6: memref<2x1x2xf32, #tpu.memory_space<vmem>>) attributes {dimension_semantics = [#tpu.dimension_semantics<parallel>], iteration_bounds = array<i64: 1>, scalar_prefetch = 0 : i64, scratch_operands = 0 : i64, tpu.core_type = #tpu.core_type<tc>, window_params = [{transform_indices = @transform_0, window_bounds = array<i64: 2, 28, 270>}, {pipeline_mode = #tpu.pipeline_mode<synchronous>, transform_indices = @transform_1, window_bounds = array<i64: 270, 168>}, {pipeline_mode = #tpu.pipeline_mode<synchronous>, transform_indices = @transform_2, window_bounds = array<i64: 1, 168>}, {pipeline_mode = #tpu.pipeline_mode<synchronous>, transform_indices = @transform_3, window_bounds = array<i64: 2, 27, 167>}, {pipeline_mode = #tpu.pipeline_mode<synchronous>, transform_indices = @transform_4, window_bounds = array<i64: 1, 2>}, {transform_indices = @transform_5, window_bounds = array<i64: 2, 1, 2>}]} {
    %0 = tpu.iota {dimensions = array<i32: 1>} : vector<1x2xi32>
    %c0 = arith.constant 0 : index
    %c0_0 = arith.constant 0 : index
    %c0_1 = arith.constant 0 : index
    %1 = vector.load %arg1[%c0, %c0_0, %c0_1] : memref<2x28x270xbf16, #tpu.memory_space<vmem>>, vector<1x28x270xbf16>
    %2 = vector.shape_cast %1 : vector<1x28x270xbf16> to vector<28x270xbf16>
    %c0_2 = arith.constant 0 : index
    %c0_3 = arith.constant 0 : index
    %3 = vector.load %arg2[%c0_2, %c0_3] : memref<270x168xbf16, #tpu.memory_space<vmem>>, vector<270x168xbf16>
    %cst = arith.constant dense<0.000000e+00> : vector<28x168xf32>
    %4 = tpu.matmul %2, %3, %cst {dimension_numbers = #tpu.dot_dimension_numbers<[1], [0], [0], [1], [0, 0, 1, 1], [], []>} : vector<28x270xbf16>, vector<270x168xbf16>, vector<28x168xf32> -> vector<28x168xf32>
    %c0_4 = arith.constant 0 : index
    %c0_5 = arith.constant 0 : index
    %5 = vector.load %arg3[%c0_4, %c0_5] : memref<1x168xf32, #tpu.memory_space<vmem>>, vector<1x168xf32>
    %6 = vector.broadcast %5 : vector<1x168xf32> to vector<28x168xf32>
    %7 = arith.addf %4, %6 : vector<28x168xf32>
    %cst_6 = arith.constant 0.000000e+00 : f32
    %8 = vector.broadcast %cst_6 : f32 to vector<28x168xf32>
    %9 = arith.maximumf %7, %8 : vector<28x168xf32>
    %10 = vector.extract_strided_slice %9 {offsets = [0, 0], sizes = [27, 168], strides = [1, 1]} : vector<28x168xf32> to vector<27x168xf32>
    %11 = vector.extract_strided_slice %9 {offsets = [1, 0], sizes = [27, 168], strides = [1, 1]} : vector<28x168xf32> to vector<27x168xf32>
    %12 = arith.maximumf %10, %11 : vector<27x168xf32>
    %13 = vector.extract_strided_slice %12 {offsets = [0, 0], sizes = [27, 167], strides = [1, 1]} : vector<27x168xf32> to vector<27x167xf32>
    %14 = vector.extract_strided_slice %12 {offsets = [0, 1], sizes = [27, 167], strides = [1, 1]} : vector<27x168xf32> to vector<27x167xf32>
    %15 = arith.maximumf %13, %14 : vector<27x167xf32>
    %c0_7 = arith.constant 0 : index
    %c0_8 = arith.constant 0 : index
    %c0_9 = arith.constant 0 : index
    %16 = vector.load %arg4[%c0_7, %c0_8, %c0_9] : memref<2x27x167xf32, #tpu.memory_space<vmem>>, vector<1x27x167xf32>
    %17 = vector.shape_cast %16 : vector<1x27x167xf32> to vector<27x167xf32>
    %18 = arith.mulf %15, %17 : vector<27x167xf32>
    %19 = vector.shape_cast %18 : vector<27x167xf32> to vector<1x27x167xf32>
    %cst_10 = arith.constant dense<0.000000e+00> : vector<1xf32>
    %20 = vector.multi_reduction <add>, %19, %cst_10 [1, 2] : vector<1x27x167xf32> to vector<1xf32>
    %21 = vector.shape_cast %20 : vector<1xf32> to vector<1x1x1xf32>
    %22 = vector.extract %21[0, 0, 0] : f32 from vector<1x1x1xf32>
    %23 = vector.broadcast %22 : f32 to vector<1x1xf32>
    %c1 = arith.constant 1 : index
    %c0_11 = arith.constant 0 : index
    %c0_12 = arith.constant 0 : index
    %24 = vector.load %arg4[%c1, %c0_11, %c0_12] : memref<2x27x167xf32, #tpu.memory_space<vmem>>, vector<1x27x167xf32>
    %25 = vector.shape_cast %24 : vector<1x27x167xf32> to vector<27x167xf32>
    %26 = arith.mulf %15, %25 : vector<27x167xf32>
    %27 = vector.shape_cast %26 : vector<27x167xf32> to vector<1x27x167xf32>
    %cst_13 = arith.constant dense<0.000000e+00> : vector<1xf32>
    %28 = vector.multi_reduction <add>, %27, %cst_13 [1, 2] : vector<1x27x167xf32> to vector<1xf32>
    %29 = vector.shape_cast %28 : vector<1xf32> to vector<1x1x1xf32>
    %30 = vector.extract %29[0, 0, 0] : f32 from vector<1x1x1xf32>
    %31 = vector.broadcast %30 : f32 to vector<1x1xf32>
    %c0_i32 = arith.constant 0 : i32
    %32 = vector.broadcast %c0_i32 : i32 to vector<1x2xi32>
    %33 = arith.cmpi eq, %0, %32 : vector<1x2xi32>
    %34 = vector.shape_cast %23 : vector<1x1xf32> to vector<1x1xf32>
    %35 = vector.broadcast %34 : vector<1x1xf32> to vector<1x2xf32>
    %36 = vector.shape_cast %31 : vector<1x1xf32> to vector<1x1xf32>
    %37 = vector.broadcast %36 : vector<1x1xf32> to vector<1x2xf32>
    %38 = arith.select %33, %35, %37 : vector<1x2xi1>, vector<1x2xf32>
    %c0_14 = arith.constant 0 : index
    %c0_15 = arith.constant 0 : index
    %39 = vector.load %arg5[%c0_14, %c0_15] : memref<1x2xf32, #tpu.memory_space<vmem>>, vector<1x2xf32>
    %40 = arith.addf %38, %39 : vector<1x2xf32>
    %c0_16 = arith.constant 0 : index
    %c0_17 = arith.constant 0 : index
    %c0_18 = arith.constant 0 : index
    %41 = vector.load %arg6[%c0_16, %c0_17, %c0_18] : memref<2x1x2xf32, #tpu.memory_space<vmem>>, vector<1x1x2xf32>
    %42 = vector.shape_cast %41 : vector<1x1x2xf32> to vector<1x2xf32>
    %43 = vector.shape_cast %40 : vector<1x2xf32> to vector<1x1x2xf32>
    tpu.vector_store %arg6[%c0_16, %c0_17, %c0_18], %43 {strides = array<i32>} : memref<2x1x2xf32, #tpu.memory_space<vmem>>, vector<1x1x2xf32>,
    %c1_19 = arith.constant 1 : index
    %c0_20 = arith.constant 0 : index
    %c0_21 = arith.constant 0 : index
    %44 = vector.load %arg1[%c1_19, %c0_20, %c0_21] : memref<2x28x270xbf16, #tpu.memory_space<vmem>>, vector<1x28x270xbf16>
    %45 = vector.shape_cast %44 : vector<1x28x270xbf16> to vector<28x270xbf16>
    %c0_22 = arith.constant 0 : index
    %c0_23 = arith.constant 0 : index
    %46 = vector.load %arg2[%c0_22, %c0_23] : memref<270x168xbf16, #tpu.memory_space<vmem>>, vector<270x168xbf16>
    %cst_24 = arith.constant dense<0.000000e+00> : vector<28x168xf32>
    %47 = tpu.matmul %45, %46, %cst_24 {dimension_numbers = #tpu.dot_dimension_numbers<[1], [0], [0], [1], [0, 0, 1, 1], [], []>} : vector<28x270xbf16>, vector<270x168xbf16>, vector<28x168xf32> -> vector<28x168xf32>
    %c0_25 = arith.constant 0 : index
    %c0_26 = arith.constant 0 : index
    %48 = vector.load %arg3[%c0_25, %c0_26] : memref<1x168xf32, #tpu.memory_space<vmem>>, vector<1x168xf32>
    %49 = vector.broadcast %48 : vector<1x168xf32> to vector<28x168xf32>
    %50 = arith.addf %47, %49 : vector<28x168xf32>
    %cst_27 = arith.constant 0.000000e+00 : f32
    %51 = vector.broadcast %cst_27 : f32 to vector<28x168xf32>
    %52 = arith.maximumf %50, %51 : vector<28x168xf32>
    %53 = vector.extract_strided_slice %52 {offsets = [0, 0], sizes = [27, 168], strides = [1, 1]} : vector<28x168xf32> to vector<27x168xf32>
    %54 = vector.extract_strided_slice %52 {offsets = [1, 0], sizes = [27, 168], strides = [1, 1]} : vector<28x168xf32> to vector<27x168xf32>
    %55 = arith.maximumf %53, %54 : vector<27x168xf32>
    %56 = vector.extract_strided_slice %55 {offsets = [0, 0], sizes = [27, 167], strides = [1, 1]} : vector<27x168xf32> to vector<27x167xf32>
    %57 = vector.extract_strided_slice %55 {offsets = [0, 1], sizes = [27, 167], strides = [1, 1]} : vector<27x168xf32> to vector<27x167xf32>
    %58 = arith.maximumf %56, %57 : vector<27x167xf32>
    %c0_28 = arith.constant 0 : index
    %c0_29 = arith.constant 0 : index
    %c0_30 = arith.constant 0 : index
    %59 = vector.load %arg4[%c0_28, %c0_29, %c0_30] : memref<2x27x167xf32, #tpu.memory_space<vmem>>, vector<1x27x167xf32>
    %60 = vector.shape_cast %59 : vector<1x27x167xf32> to vector<27x167xf32>
    %61 = arith.mulf %58, %60 : vector<27x167xf32>
    %62 = vector.shape_cast %61 : vector<27x167xf32> to vector<1x27x167xf32>
    %cst_31 = arith.constant dense<0.000000e+00> : vector<1xf32>
    %63 = vector.multi_reduction <add>, %62, %cst_31 [1, 2] : vector<1x27x167xf32> to vector<1xf32>
    %64 = vector.shape_cast %63 : vector<1xf32> to vector<1x1x1xf32>
    %65 = vector.extract %64[0, 0, 0] : f32 from vector<1x1x1xf32>
    %66 = vector.broadcast %65 : f32 to vector<1x1xf32>
    %c1_32 = arith.constant 1 : index
    %c0_33 = arith.constant 0 : index
    %c0_34 = arith.constant 0 : index
    %67 = vector.load %arg4[%c1_32, %c0_33, %c0_34] : memref<2x27x167xf32, #tpu.memory_space<vmem>>, vector<1x27x167xf32>
    %68 = vector.shape_cast %67 : vector<1x27x167xf32> to vector<27x167xf32>
    %69 = arith.mulf %58, %68 : vector<27x167xf32>
    %70 = vector.shape_cast %69 : vector<27x167xf32> to vector<1x27x167xf32>
    %cst_35 = arith.constant dense<0.000000e+00> : vector<1xf32>
    %71 = vector.multi_reduction <add>, %70, %cst_35 [1, 2] : vector<1x27x167xf32> to vector<1xf32>
    %72 = vector.shape_cast %71 : vector<1xf32> to vector<1x1x1xf32>
    %73 = vector.extract %72[0, 0, 0] : f32 from vector<1x1x1xf32>
    %74 = vector.broadcast %73 : f32 to vector<1x1xf32>
    %c0_i32_36 = arith.constant 0 : i32
    %75 = vector.broadcast %c0_i32_36 : i32 to vector<1x2xi32>
    %76 = arith.cmpi eq, %0, %75 : vector<1x2xi32>
    %77 = vector.shape_cast %66 : vector<1x1xf32> to vector<1x1xf32>
    %78 = vector.broadcast %77 : vector<1x1xf32> to vector<1x2xf32>
    %79 = vector.shape_cast %74 : vector<1x1xf32> to vector<1x1xf32>
    %80 = vector.broadcast %79 : vector<1x1xf32> to vector<1x2xf32>
    %81 = arith.select %76, %78, %80 : vector<1x2xi1>, vector<1x2xf32>
    %c0_37 = arith.constant 0 : index
    %c0_38 = arith.constant 0 : index
    %82 = vector.load %arg5[%c0_37, %c0_38] : memref<1x2xf32, #tpu.memory_space<vmem>>, vector<1x2xf32>
    %83 = arith.addf %81, %82 : vector<1x2xf32>
    %c1_39 = arith.constant 1 : index
    %c0_40 = arith.constant 0 : index
    %c0_41 = arith.constant 0 : index
    %84 = vector.load %arg6[%c1_39, %c0_40, %c0_41] : memref<2x1x2xf32, #tpu.memory_space<vmem>>, vector<1x1x2xf32>
    %85 = vector.shape_cast %84 : vector<1x1x2xf32> to vector<1x2xf32>
    %86 = vector.shape_cast %83 : vector<1x2xf32> to vector<1x1x2xf32>
    tpu.vector_store %arg6[%c1_39, %c0_40, %c0_41], %86 {strides = array<i32>} : memref<2x1x2xf32, #tpu.memory_space<vmem>>, vector<1x1x2xf32>,
    return
  }
  func.func @transform_0(%arg0: i32) -> (i32, i32, i32) {
    %c0_i32 = arith.constant 0 : i32
    %c0_i32_0 = arith.constant 0 : i32
    %c0_i32_1 = arith.constant 0 : i32
    return %arg0, %c0_i32, %c0_i32_0 : i32, i32, i32
  }
  func.func @transform_1(%arg0: i32) -> (i32, i32) {
    %c0_i32 = arith.constant 0 : i32
    %c0_i32_0 = arith.constant 0 : i32
    %c0_i32_1 = arith.constant 0 : i32
    return %c0_i32, %c0_i32_0 : i32, i32
  }
  func.func @transform_2(%arg0: i32) -> (i32, i32) {
    %c0_i32 = arith.constant 0 : i32
    %c0_i32_0 = arith.constant 0 : i32
    %c0_i32_1 = arith.constant 0 : i32
    return %c0_i32, %c0_i32_0 : i32, i32
  }
  func.func @transform_3(%arg0: i32) -> (i32, i32, i32) {
    %c0_i32 = arith.constant 0 : i32
    %c0_i32_0 = arith.constant 0 : i32
    %c0_i32_1 = arith.constant 0 : i32
    %c0_i32_2 = arith.constant 0 : i32
    return %c0_i32, %c0_i32_0, %c0_i32_1 : i32, i32, i32
  }
  func.func @transform_4(%arg0: i32) -> (i32, i32) {
    %c0_i32 = arith.constant 0 : i32
    %c0_i32_0 = arith.constant 0 : i32
    %c0_i32_1 = arith.constant 0 : i32
    return %c0_i32, %c0_i32_0 : i32, i32
  }
  func.func @transform_5(%arg0: i32) -> (i32, i32, i32) {
    %c0_i32 = arith.constant 0 : i32
    %c0_i32_0 = arith.constant 0 : i32
    %c0_i32_1 = arith.constant 0 : i32
    return %arg0, %c0_i32, %c0_i32_0 : i32, i32, i32
  }
}

</mosaic_0001>

<bundles_post_ra>
// kernel: forward.1
= control target key start
LH: loop header
LB: loop body
LE: loop exit
PB: predicated region body
PF: predicated region fallthrough
CT: control target
= control target key end

     0   :  { %s1769_s0 = inlined_call_operand.vmem [shape: bf16[2,28,270], index: 0, kind: input, shape index: {}]   ;;  %s1770_s1 = inlined_call_operand.vmem [shape: bf16[270,168], index: 1, kind: input, shape index: {}]   ;;  %s1771_s2 = inlined_call_operand.vmem [shape: f32[1,168], index: 2, kind: input, shape index: {}]   ;;  %s1772_s3 = inlined_call_operand.vmem [shape: f32[2,27,167], index: 3, kind: input, shape index: {}]   ;;  %s1773_s4 = inlined_call_operand.vmem [shape: f32[1,2], index: 4, kind: input, shape index: {}]   ;;  %s1774_s5 = inlined_call_operand.hbm [shape: f32[2,1,2], index: 5, kind: output, shape index: {}]  }
   0x1   :  { %v1286_v0 = vld [vmem:[%s1770_s1 + $0x4] ss:$8 sps:$4 sm:$0xff]   ;;  %v1288_v1 = vld [vmem:[%s1770_s1] ss:$8 sps:$4 sm:$0xff]   ;;  %v1289_v2 = vld [vmem:[%s1770_s1 + $0x14] ss:$8 sps:$4 sm:$0xff]  }
   0x2   :  { %290 = vmatprep.subr.bf16.mxu0 %v1286_v0  ;;  %838 = vmatprep.subr.bf16.mxu1 %v1286_v0  ;;  %v1291_v3 = vld [vmem:[%s1770_s1 + $0x10] ss:$8 sps:$4 sm:$0xff]   ;;  %v1292_v4 = vld [vmem:[%s1770_s1 + $0x24] ss:$8 sps:$4 sm:$0xff]   ;;  %v1294_v5 = vld [vmem:[%s1770_s1 + $0x20] ss:$8 sps:$4 sm:$0xff]  }
   0x3   :  { %291 = vmatpush1.bf16.msra.mxu0 %v1288_v1  ;;  %839 = vmatpush1.bf16.msra.mxu1 %v1288_v1  ;;  %v1295_v6 = vld [vmem:[%s1770_s1 + $0x34] ss:$8 sps:$4 sm:$0xff]   ;;  %v1297_v7 = vld [vmem:[%s1770_s1 + $0x30] ss:$8 sps:$4 sm:$0xff]   ;;  %v1298_v8 = vld [vmem:[%s1770_s1 + $0x44] ss:$8 sps:$4 sm:$0xff]  }
   0x4   :  { %292 = vmatprep.subr.bf16.mxu0 %v1289_v2  ;;  %840 = vmatprep.subr.bf16.mxu1 %v1289_v2  ;;  %v1300_v9 = vld [vmem:[%s1770_s1 + $0x40] ss:$8 sps:$4 sm:$0xff]   ;;  %v1301_v10 = vld [vmem:[%s1770_s1 + $0x54] ss:$8 sps:$4 sm:$0xff]   ;;  %v1303_v11 = vld [vmem:[%s1770_s1 + $0x50] ss:$8 sps:$4 sm:$0xff]  }
   0x5   :  { %v1304_v12 = vld [vmem:[%s1770_s1 + $0x64] ss:$8 sps:$4 sm:$0xff]   ;;  %v1306_v14 = vld [vmem:[%s1770_s1 + $0x60] ss:$8 sps:$4 sm:$0xff]   ;;  %v1307_v16 = vld [vmem:[%s1770_s1 + $0x74] ss:$8 sps:$4 sm:$0xff]  }
   0x6   :  { %v1336_v13 = vld [vmem:[%s1769_s0 + $0x4] ss:$12 sps:$4 sm:$0xff]   ;;  %v1339_v15 = vld [vmem:[%s1769_s0 + $0x34] ss:$12 sps:$4 sm:$0xff]  }
   0x7   :  { %293 = vmatpush1.bf16.msra.mxu0 %v1291_v3  ;;  %841 = vmatpush1.bf16.msra.mxu1 %v1291_v3  ;;  %v1309_v17 = vld [vmem:[%s1770_s1 + $0x70] ss:$8 sps:$4 sm:$0xff]   ;;  %v1310_v18 = vld [vmem:[%s1770_s1 + $0x84] ss:$8 sps:$4 sm:$0xff]   ;;  %v1312_v19 = vld [vmem:[%s1770_s1 + $0x80] ss:$8 sps:$4 sm:$0xff]  }
   0x8   :  { %294 = vmatprep.subr.bf16.mxu0 %v1292_v4  ;;  %842 = vmatprep.subr.bf16.mxu1 %v1292_v4  ;;  %v1313_v20 = vld [vmem:[%s1770_s1 + $0x94] ss:$8 sps:$4 sm:$0xff]  }
   0x9   :  { %322 = vmatprep.mubr.bf16.mxu0 %v1336_v13  ;;  %870 = vmatprep.mubr.bf16.mxu1 %v1339_v15 }
   0xb   :  { %295 = vmatpush1.bf16.msra.mxu0 %v1294_v5  ;;  %843 = vmatpush1.bf16.msra.mxu1 %v1294_v5 }
   0xc   :  { %296 = vmatprep.subr.bf16.mxu0 %v1295_v6  ;;  %844 = vmatprep.subr.bf16.mxu1 %v1295_v6 }
   0xf   :  { %297 = vmatpush1.bf16.msra.mxu0 %v1297_v7  ;;  %845 = vmatpush1.bf16.msra.mxu1 %v1297_v7 }
  0x10   :  { %298 = vmatprep.subr.bf16.mxu0 %v1298_v8  ;;  %846 = vmatprep.subr.bf16.mxu1 %v1298_v8 }
  0x13   :  { %299 = vmatpush1.bf16.msra.mxu0 %v1300_v9  ;;  %847 = vmatpush1.bf16.msra.mxu1 %v1300_v9 }
  0x14   :  { %300 = vmatprep.subr.bf16.mxu0 %v1301_v10  ;;  %848 = vmatprep.subr.bf16.mxu1 %v1301_v10 }
  0x17   :  { %301 = vmatpush1.bf16.msra.mxu0 %v1303_v11  ;;  %849 = vmatpush1.bf16.msra.mxu1 %v1303_v11 }
  0x18   :  { %302 = vmatprep.subr.bf16.mxu0 %v1304_v12  ;;  %850 = vmatprep.subr.bf16.mxu1 %v1304_v12 }
  0x1b   :  { %303 = vmatpush1.bf16.msra.mxu0 %v1306_v14  ;;  %851 = vmatpush1.bf16.msra.mxu1 %v1306_v14 }
  0x1c   :  { %304 = vmatprep.subr.bf16.mxu0 %v1307_v16  ;;  %852 = vmatprep.subr.bf16.mxu1 %v1307_v16 }
  0x1f   :  { %305 = vmatpush1.bf16.msra.mxu0 %v1309_v17  ;;  %853 = vmatpush1.bf16.msra.mxu1 %v1309_v17 }
  0x20   :  { %306 = vmatprep.subr.bf16.mxu0 %v1310_v18  ;;  %854 = vmatprep.subr.bf16.mxu1 %v1310_v18 }
  0x21   :  { %10 = vsyncpa [#allocation3], 0  ;;  %v1315_v21 = vld [vmem:[%s1770_s1 + $0x90] ss:$8 sps:$4 sm:$0xff]   ;;  %v1316_v22 = vld [vmem:[%s1770_s1 + $0xa4] ss:$8 sps:$4 sm:$0xff]   ;;  %v22_v54 = vlaneseq }
  0x22   :  { %v1318_v23 = vld [vmem:[%s1770_s1 + $0xa0] ss:$8 sps:$4 sm:$0xff]   ;;  %v1319_v24 = vld [vmem:[%s1770_s1 + $0xb4] ss:$8 sps:$4 sm:$0xff]   ;;  %v1321_v25 = vld [vmem:[%s1770_s1 + $0xb0] ss:$8 sps:$4 sm:$0xff]  }
  0x23   :  { %307 = vmatpush1.bf16.msra.mxu0 %v1312_v19  ;;  %855 = vmatpush1.bf16.msra.mxu1 %v1312_v19  ;;  %v1322_v26 = vld [vmem:[%s1770_s1 + $0xc4] ss:$8 sps:$4 sm:$0xff]   ;;  %v1324_v27 = vld [vmem:[%s1770_s1 + $0xc0] ss:$8 sps:$4 sm:$0xff]   ;;  %v1325_v28 = vld [vmem:[%s1770_s1 + $0xd4] ss:$8 sps:$4 sm:$0xff]  }
  0x24   :  { %308 = vmatprep.subr.bf16.mxu0 %v1313_v20  ;;  %856 = vmatprep.subr.bf16.mxu1 %v1313_v20  ;;  %v1327_v29 = vld [vmem:[%s1770_s1 + $0xd0] ss:$8 sps:$4 sm:$0xff]   ;;  %v1328_v30 = vld [vmem:[%s1770_s1 + $0xe4] ss:$8 sps:$4 sm:$0xff]   ;;  %v1330_v31 = vld [vmem:[%s1770_s1 + $0xe0] ss:$8 sps:$4 sm:$0xff]  }
  0x25   :  { %v1331_v32 = vld [vmem:[%s1770_s1 + $0xf4] ss:$8 sps:$4 sm:$0xff]   ;;  %v64_v33 = vld [vmem:[%s1770_s1 + $0x100] sm:$0xff]  ;;  %v65_v34 = vld [vmem:[%s1770_s1 + $0x108] sm:$0x77]  ;;  %vm283_vm0 = vcmask 1046528  }
  0x26   :  { %v615_v35 = vld [vmem:[%s1770_s1 + $0x108] sm:$0x77]  ;;  %v1333_v36 = vld [vmem:[%s1770_s1 + $0xf0] ss:$8 sps:$4 sm:$0xff]   ;;  %v1170_v37 = vcombine.high %v64_v33, %v65_v34  ;;  %v1169_v39 = vcombine.low %v64_v33, %v65_v34  ;;  %v1378_v49 = vmov 0   ;;  %vm276_vm1 = vcmask 113664  }
  0x27   :  { %309 = vmatpush1.bf16.msra.mxu0 %v1315_v21  ;;  %857 = vmatpush1.bf16.msra.mxu1 %v1315_v21  ;;  %v1229_v38 = vcombine.high %v64_v33, %v615_v35  ;;  %v1228_v40 = vcombine.low %v64_v33, %v615_v35  ;;  %v1334_v41 = vld [vmem:[%s1769_s0] ss:$12 sps:$4 sm:$0xff]   ;;  %v1337_v42 = vld [vmem:[%s1769_s0 + $0x30] ss:$12 sps:$4 sm:$0xff]   ;;  %v1350_v50 = vld [vmem:[%s1769_s0 + $0x8] ss:$12 sps:$4 sm:$0xff]  }
  0x28   :  { %310 = vmatprep.subr.bf16.mxu0 %v1316_v22  ;;  %858 = vmatprep.subr.bf16.mxu1 %v1316_v22  ;;  %v1344_v43 = vld [vmem:[%s1769_s0 + $0x1c] ss:$12 sps:$4 sm:$0x3f]   ;;  %v285_v44 = vsel %vm283_vm0, %v1169_v39, 0  ;;  %v1351_v51 = vld [vmem:[%s1769_s0 + $0x38] ss:$12 sps:$4 sm:$0xff]  }
  0x29   :  { %v833_v45 = vsel %vm283_vm0, %v1228_v40, 0  ;;  %v1346_v46 = vld [vmem:[%s1769_s0 + $0x4c] ss:$12 sps:$4 sm:$0x3f]   ;;  %v69_v55 = vshrl.u32 %v22_v54, 7  ;;  %vm466_vm2 = vcmask 1039360  }
  0x2a   :  { %v1348_v47 = vld [vmem:[%s1769_s0 + $0x18] ss:$12 sps:$4 sm:$0x3f]   ;;  %v1349_v48 = vld [vmem:[%s1769_s0 + $0x48] ss:$12 sps:$4 sm:$0x3f]  }
  0x2b   :  { %311 = vmatpush1.bf16.msra.mxu0 %v1318_v23  ;;  %859 = vmatpush1.bf16.msra.mxu1 %v1318_v23  ;;  %v1352_v52 = vld [vmem:[%s1769_s0 + $0x20] ss:$12 sps:$4 sm:$0x3f]   ;;  %v1353_v53 = vld [vmem:[%s1769_s0 + $0x50] ss:$12 sps:$4 sm:$0x3f]  }
  0x2c   :  { %312 = vmatprep.subr.bf16.mxu0 %v1319_v24  ;;  %860 = vmatprep.subr.bf16.mxu1 %v1319_v24  ;;  %v70_v56 = vsub.s32 0, %v69_v55  ;;  %v66_v57 = vld [vmem:[%s1771_s2] sm:$0x3]  ;;  %v74_v59 = vsub.s32 1, %v69_v55  ;;  %s1379_s0 = smov 127   ;;  %vm503_vm3 = vcmask 318464  }
  0x2d   :  { %v616_v58 = vld [vmem:[%s1771_s2] sm:$0x3]  ;;  %vm515_vm4 = vcmask 313344   ;;  %vm512_vm5 = vcmask 1042432   ;;  %vm571_vm7 = vcmask 8192   ;;  %s1380_s7 = smov [#allocation2]  }
  0x2e   :  { %v71_v60 = vrot.slane %v66_v57, %v70_v56  ;;  %v621_v61 = vrot.slane %v616_v58, %v70_v56  ;;  %v75_v62 = vrot.slane %v66_v57, %v74_v59  ;;  %v625_v1 = vrot.slane %v616_v58, %v74_v59  ;;  %s1120_s8 = sshll.u32 %s1380_s7, 4  ;;  %s1121_s8 = int_to_ptr.vmem [resolvable:$true] %s1120_s8 }
  0x2f   :  { %313 = vmatpush1.bf16.msra.mxu0 %v1321_v25  ;;  %861 = vmatpush1.bf16.msra.mxu1 %v1321_v25  ;;  %s1354_s9 = scalar_lea.vmem %s1121_s8, 32  ;;  %p1359_p1 = scmp.lt.s32.totalorder %s1121_s8, %s1121_s8 }
  0x30   :  { %314 = vmatprep.subr.bf16.mxu0 %v1322_v26  ;;  %862 = vmatprep.subr.bf16.mxu1 %v1322_v26  ;;  %p1355_p0 = scmp.ne.s32.totalorder %s1121_s8, %s1354_s9  ;;  %p1360_p2 = scmp.lt.s32.totalorder %s1354_s9, %s1354_s9 }
  0x32   :  { %p1361_p3 = por %p1360_p2, %p1359_p1 }
  0x33   :  { %315 = vmatpush1.bf16.msra.mxu0 %v1324_v27  ;;  %863 = vmatpush1.bf16.msra.mxu1 %v1324_v27 }
  0x34   :  { %316 = vmatprep.subr.bf16.mxu0 %v1325_v28  ;;  %864 = vmatprep.subr.bf16.mxu1 %v1325_v28  ;;  %p1362_p4 = pnand %p1361_p3, %p1355_p0 }
  0x37   :  { %317 = vmatpush1.bf16.msra.mxu0 %v1327_v29  ;;  %865 = vmatpush1.bf16.msra.mxu1 %v1327_v29 }
  0x38   :  { %318 = vmatprep.subr.bf16.mxu0 %v1328_v30  ;;  %866 = vmatprep.subr.bf16.mxu1 %v1328_v30 }
  0x3b   :  { %319 = vmatpush1.bf16.msra.mxu0 %v1330_v31  ;;  %867 = vmatpush1.bf16.msra.mxu1 %v1330_v31 }
  0x3c   :  { %320 = vmatprep.subr.bf16.mxu0 %v1331_v32  ;;  %868 = vmatprep.subr.bf16.mxu1 %v1331_v32 }
  0x3f   :  { %321 = vmatpush1.bf16.msra.mxu0 %v1333_v36  ;;  %869 = vmatpush1.bf16.msra.mxu1 %v1333_v36 }
  0x40   :  { %1171 = vmatprep.subr.msk.bf16.mxu0 %vm283_vm0, %v1170_v37  ;;  %1230 = vmatprep.subr.msk.bf16.mxu1 %vm283_vm0, %v1229_v38 }
  0x42   :  { %323 = vmatmul.mubr.bf16.vlgmr.msra.gmra.mrb[0].mxu0 %v1334_v41  ;;  %871 = vmatmul.mubr.bf16.vlgmr.msra.gmra.mrb[0].mxu1 %v1337_v42 }
  0x43   :  { %344 = vmatpush1.bf16.msra.mxu0 %v285_v44  ;;  %892 = vmatpush1.bf16.msra.mxu1 %v833_v45 }
  0x44   :  { %332 = vmatprep.mubr.bf16.mxu0 %v1344_v43  ;;  %880 = vmatprep.mubr.bf16.mxu1 %v1346_v46 }
  0x4a   :  { %333 = vmatmul.mubr.bf16.gmra.mrb[4].mxu0 %v1348_v47  ;;  %881 = vmatmul.mubr.bf16.gmra.mrb[4].mxu1 %v1349_v48 }
  0x4b   :  { %375 = vmatprep.mubr.bf16.mxu0 %v1378_v49  ;;  %923 = vmatprep.mubr.bf16.mxu1 %v1378_v49 }
  0x52   :  { %1172 = vmatmul.mubr.msk.bf16.vlgmr.msra.gmra.mrb[0].mxu0 %vm276_vm1, %v1350_v50  ;;  %1231 = vmatmul.mubr.msk.bf16.vlgmr.msra.gmra.mrb[0].mxu1 %vm276_vm1, %v1351_v51 }
  0x53   :  { %385 = vmatprep.mubr.bf16.mxu0 %v1378_v49  ;;  %933 = vmatprep.mubr.bf16.mxu1 %v1378_v49 }
  0x5a   :  { %1173 = vmatmul.mubr.msk.bf16.gmra.mrb[4].mxu0 %vm276_vm1, %v1352_v52  ;;  %1232 = vmatmul.mubr.msk.bf16.gmra.mrb[4].mxu1 %vm276_vm1, %v1353_v53 }
 0x125   :  { %v377_v63 = vpop.f32.mrb[0].mxu0  ;;  %v925_v0 = vpop.f32.mrb[0].mxu1 }
 0x126   :  { %v1241_v2 = vadd.f32 %v377_v63, %v71_v60  ;;  %v1249_v3 = vadd.f32 %v925_v0, %v621_v61  ;;  %v379_v4 = vpop.f32.mrb[1].mxu0  ;;  %v927_v5 = vpop.f32.mrb[1].mxu1 }
 0x127   :  { %v1565_v6 = vadd.f32 %v379_v4, %v75_v62  ;;  %v381_v7 = vpop.f32.mrb[2].mxu0  ;;  %v929_v8 = vpop.f32.mrb[2].mxu1  ;;  %v1250_v16 = vadd.f32 %v927_v5, %v625_v1 }
 0x128   :  { %v396_v9 = vmax.f32 %v1241_v2, 0.0  ;;  %v944_v10 = vmax.f32 %v1249_v3, 0.0  ;;  %v1567_v11 = vadd.f32 %v381_v7, %v71_v60  ;;  %v1569_v12 = vadd.f32 %v929_v8, %v621_v61  ;;  %v383_v13 = vpop.f32.mrb[3].mxu0  ;;  %v931_v14 = vpop.f32.mrb[3].mxu1 }
 0x129   :  { %v397_v15 = vmax.f32 %v1565_v6, 0.0  ;;  %v1572_v17 = vadd.f32 %v383_v13, %v75_v62  ;;  %v1574_v18 = vadd.f32 %v931_v14, %v625_v1  ;;  %v945_v28 = vmax.f32 %v1250_v16, 0.0 }
 0x12a   :  { %v398_v19 = vmax.f32 %v1567_v11, 0.0  ;;  %v946_v20 = vmax.f32 %v1569_v12, 0.0  ;;  %v412_v23 = vrot.slane %v396_v9, 1  ;;  %v960_v24 = vrot.slane %v944_v10, 1 }
 0x12b   :  { %v399_v21 = vmax.f32 %v1572_v17, 0.0  ;;  %v947_v22 = vmax.f32 %v1574_v18, 0.0  ;;  %v415_v27 = vrot.slane %v397_v15, 1  ;;  %v963_v56 = vrot.slane %v945_v28, 1 }
 0x12c   :  { %v413_v25 = vrot.slane %v398_v19, 1  ;;  %v961_v26 = vrot.slane %v946_v20, 1 }
 0x12d   :  { %v416_v29 = vrot.slane %v399_v21, 1  ;;  %v964_v30 = vrot.slane %v947_v22, 1  ;;  %v387_v31 = vpop.f32.mrb[4].mxu0  ;;  %v935_v32 = vpop.f32.mrb[4].mxu1 }
 0x12e   :  { %v1245_v33 = vadd.f32 %v387_v31, %v71_v60  ;;  %v1253_v34 = vadd.f32 %v935_v32, %v621_v61  ;;  %v389_v35 = vpop.f32.mrb[5].mxu0  ;;  %v937_v36 = vpop.f32.mrb[5].mxu1  ;;  %v962_v37 = vsel %vm283_vm0, %v960_v24, %v961_v26  ;;  %v414_v38 = vsel %vm283_vm0, %v412_v23, %v413_v25 }
 0x12f   :  { %v1246_v39 = vadd.f32 %v389_v35, %v75_v62  ;;  %v1254_v40 = vadd.f32 %v937_v36, %v625_v1  ;;  %v391_v41 = vpop.f32.mrb[6].mxu0  ;;  %v939_v42 = vpop.f32.mrb[6].mxu1  ;;  %v1586_v43 = vmax.f32 %v944_v10, %v962_v37  ;;  %v1588_v44 = vmax.f32 %v396_v9, %v414_v38  ;;  %v1234_v37 = vld [vmem:[%s1772_s3 + $0x48] sm:$0xff] }
 0x130   :  { %v400_v45 = vmax.f32 %v1245_v33, 0.0  ;;  %v948_v46 = vmax.f32 %v1253_v34, 0.0  ;;  %v1247_v47 = vadd.f32 %v391_v41, %v71_v60  ;;  %v1255_v48 = vadd.f32 %v939_v42, %v621_v61  ;;  %v393_v49 = vpop.f32.mrb[7].mxu0  ;;  %v941_v50 = vpop.f32.mrb[7].mxu1  ;;  %v1035_v33 = vld [vmem:[%s1772_s3 + $0x8] sm:$0xff] }
 0x131   :  { %v401_v51 = vmax.f32 %v1246_v39, 0.0  ;;  %v949_v52 = vmax.f32 %v1254_v40, 0.0  ;;  %v1248_v53 = vadd.f32 %v393_v49, %v75_v62  ;;  %v1256_v55 = vadd.f32 %v941_v50, %v625_v1  ;;  %998 = vrot.lane.b32.xlu1 %v1586_v43, %s1379_s0  ;;  %450 = vrot.lane.b32.xlu0 %v1588_v44, %s1379_s0  ;;  %v1034_v40 = vld [vmem:[%s1772_s3] sm:$0xff] }
 0x132   :  { %v418_v57 = vrot.slane %v400_v45, 1  ;;  %v402_v58 = vmax.f32 %v1247_v47, 0.0  ;;  %v950_v59 = vmax.f32 %v1255_v48, 0.0  ;;  %v966_v0 = vrot.slane %v948_v46, 1  ;;  %v1233_v47 = vld [vmem:[%s1772_s3 + $0x40] sm:$0xff] }
 0x133   :  { %v420_v63 = vrot.slane %v401_v51, 1  ;;  %v403_v60 = vmax.f32 %v1248_v53, 0.0  ;;  %v951_v61 = vmax.f32 %v1256_v55, 0.0  ;;  %v968_v2 = vrot.slane %v949_v52, 1 }
 0x134   :  { %v965_v3 = vsel %vm283_vm0, %v963_v56, %v964_v30  ;;  %v417_v62 = vsel %vm283_vm0, %v415_v27, %v416_v29  ;;  %v422_v1 = vrot.slane %v402_v58, 1  ;;  %v970_v7 = vrot.slane %v950_v59, 1 }
 0x135   :  { %v424_v4 = vrot.slane %v403_v60, 1  ;;  %v983_v5 = vmax.f32 %v945_v28, %v965_v3  ;;  %v435_v6 = vmax.f32 %v397_v15, %v417_v62  ;;  %v972_v8 = vrot.slane %v951_v61, 1 }
 0x136   :  { %v421_v9 = vsel %vm283_vm0, %v416_v29, %v420_v63  ;;  %v419_v10 = vsel %vm283_vm0, %v413_v25, %v418_v57  ;;  %v969_v14 = vsel %vm283_vm0, %v964_v30, %v968_v2  ;;  %v967_v16 = vsel %vm283_vm0, %v961_v26, %v966_v0 }
 0x137   :  { %1000 = vrot.lane.b32.xlu1 %v983_v5, %s1379_s0  ;;  %452 = vrot.lane.b32.xlu0 %v435_v6, %s1379_s0  ;;  %v437_v11 = vmax.f32 %v399_v21, %v421_v9  ;;  %v436_v13 = vmax.f32 %v398_v19, %v419_v10  ;;  %v425_v17 = vsel %vm283_vm0, %v420_v63, %v424_v4 }
 0x138   :  { %v985_v15 = vmax.f32 %v947_v22, %v969_v14  ;;  %v1607_v23 = vmax.f32 %v946_v20, %v967_v16  ;;  %v1609_v24 = vmax.f32 %v401_v51, %v425_v17  ;;  %v423_v25 = vsel %vm283_vm0, %v418_v57, %v422_v1 }
 0x139   :  { %v1612_v27 = vmax.f32 %v400_v45, %v423_v25  ;;  %v973_v19 = vsel %vm283_vm0, %v968_v2, %v972_v8  ;;  %v971_v21 = vsel %vm283_vm0, %v966_v0, %v970_v7  ;;  %v1625_v12 = vmax.f32 %v402_v58, %v422_v1 }
 0x13a   :  { %v1618_v18 = vmax.f32 %v949_v52, %v973_v19  ;;  %v1620_v22 = vmax.f32 %v948_v46, %v971_v21  ;;  %v1627_v20 = vmax.f32 %v403_v60, %v424_v4  ;;  %v1641_v26 = vmax.f32 %v950_v59, %v970_v7  ;;  %v490_v60 = vld [vmem:[%s1772_s3 + $0x18] sm:$0xff] }
 0x13b   :  { %456 = vrot.lane.b32.xlu1 %v437_v11, %s1379_s0  ;;  %454 = vrot.lane.b32.xlu0 %v436_v13, %s1379_s0  ;;  %v1643_v28 = vmax.f32 %v951_v61, %v972_v8  ;;  %v1177_v61 = vld [vmem:[%s1772_s3 + $0x58] sm:$0xff] }
 0x13f   :  { %1004 = vrot.lane.b32.xlu1 %v985_v15, %s1379_s0  ;;  %1002 = vrot.lane.b32.xlu0 %v1607_v23, %s1379_s0 }
 0x143   :  { %464 = vrot.lane.b32.xlu1 %v1627_v20, %s1379_s0  ;;  %462 = vrot.lane.b32.xlu0 %v1625_v12, %s1379_s0 }
 0x147   :  { %460 = vrot.lane.b32.xlu1 %v1609_v24, %s1379_s0  ;;  %458 = vrot.lane.b32.xlu0 %v1612_v27, %s1379_s0 }
 0x14b   :  { %1008 = vrot.lane.b32.xlu1 %v1618_v18, %s1379_s0  ;;  %1006 = vrot.lane.b32.xlu0 %v1620_v22, %s1379_s0 }
 0x14f   :  { %1012 = vrot.lane.b32.xlu1 %v1643_v28, %s1379_s0  ;;  %1010 = vrot.lane.b32.xlu0 %v1641_v26, %s1379_s0 }
 0x1a3   :  { %v999_v29 = vpop.permute.xlu1 %998  ;;  %v451_v30 = vpop.permute.xlu0 %450 }
 0x1a9   :  { %v1001_v31 = vpop.permute.xlu1 %1000  ;;  %v453_v32 = vpop.permute.xlu0 %452 }
 0x1aa   :  { %v467_v34 = vsel %vm466_vm2, %v451_v30, %v453_v32  ;;  %v480_v35 = vmax.f32 %v435_v6, %v453_v32  ;;  %v1014_v36 = vsel %vm466_vm2, %v999_v29, %v1001_v31  ;;  %v1027_v38 = vmax.f32 %v983_v5, %v1001_v31  ;;  %v1181_v30 = vld [vmem:[%s1772_s3 + $0x78] sm:$0x7] }
 0x1ab   :  { %v479_v39 = vmax.f32 %v1588_v44, %v467_v34  ;;  %v1026_v46 = vmax.f32 %v1586_v43, %v1014_v36  ;;  %v489_v44 = vld [vmem:[%s1772_s3 + $0x10] sm:$0xff] }
 0x1ac   :  { %v496_v41 = vmul.f32 %v1035_v33, %v480_v35  ;;  %v537_v48 = vmul.f32 %v1234_v37, %v480_v35  ;;  %v1043_v49 = vmul.f32 %v1035_v33, %v1027_v38  ;;  %v1080_v50 = vmul.f32 %v1234_v37, %v1027_v38  ;;  %v1176_v43 = vld [vmem:[%s1772_s3 + $0x50] sm:$0xff]  ;;  %v494_v33 = vld [vmem:[%s1772_s3 + $0x38] sm:$0x7] }
 0x1ad   :  { %v457_v42 = vpop.permute.xlu1 %456  ;;  %v455_v45 = vpop.permute.xlu0 %454  ;;  %v495_v51 = vmul.f32 %v1034_v40, %v479_v39  ;;  %v1042_v59 = vmul.f32 %v1034_v40, %v1026_v46  ;;  %v536_v63 = vmul.f32 %v1233_v47, %v479_v39  ;;  %v1079_v3 = vmul.f32 %v1233_v47, %v1026_v46  ;;  %v492_v39 = vld [vmem:[%s1772_s3 + $0x28] sm:$0xff]  ;;  %v1180_v46 = vld [vmem:[%s1772_s3 + $0x70] sm:$0x7] }
 0x1ae   :  { %v468_v52 = vsel %vm466_vm2, %v455_v45, %v457_v42  ;;  %v504_v53 = vsel %vm503_vm3, %v496_v41, 0.0  ;;  %v482_v55 = vmax.f32 %v437_v11, %v457_v42  ;;  %v544_v62 = vsel %vm503_vm3, %v537_v48, 0.0  ;;  %v1179_v40 = vld [vmem:[%s1772_s3 + $0x68] sm:$0xff]  ;;  %v491_v48 = vld [vmem:[%s1772_s3 + $0x20] sm:$0xff] }
 0x1af   :  { %v481_v56 = vmax.f32 %v436_v13, %v468_v52  ;;  %v1050_v5 = vsel %vm503_vm3, %v1043_v49, 0.0  ;;  %v1087_v6 = vsel %vm503_vm3, %v1080_v50, 0.0  ;;  %v505_v7 = vadd.f32 %v504_v53, %v495_v51  ;;  %v1178_v49 = vld [vmem:[%s1772_s3 + $0x60] sm:$0xff] }
 0x1b0   :  { %v498_v9 = vmul.f32 %v490_v60, %v482_v55  ;;  %v539_v10 = vmul.f32 %v1177_v61, %v482_v55  ;;  %v545_v17 = vadd.f32 %v544_v62, %v536_v63  ;;  %v1051_v21 = vadd.f32 %v1050_v5, %v1042_v59 }
 0x1b1   :  { %v1005_v57 = vpop.permute.xlu1 %1004  ;;  %v1003_v58 = vpop.permute.xlu0 %1002  ;;  %v497_v1 = vmul.f32 %v489_v44, %v481_v56  ;;  %v538_v8 = vmul.f32 %v1176_v43, %v481_v56  ;;  %v1088_v31 = vadd.f32 %v1087_v6, %v1079_v3 }
 0x1b2   :  { %v1029_v0 = vmax.f32 %v985_v15, %v1005_v57  ;;  %v1015_v2 = vsel %vm466_vm2, %v1003_v58, %v1005_v57  ;;  %v507_v35 = vsel %vm503_vm3, %v498_v9, 0.0  ;;  %v547_v36 = vsel %vm503_vm3, %v539_v10, 0.0 }
 0x1b3   :  { %v1028_v4 = vmax.f32 %v1607_v23, %v1015_v2  ;;  %v506_v23 = vadd.f32 %v505_v7, %v497_v1  ;;  %v546_v32 = vadd.f32 %v545_v17, %v538_v8 }
 0x1b4   :  { %v1045_v11 = vmul.f32 %v1029_v0, %v490_v60  ;;  %v1082_v29 = vmul.f32 %v1177_v61, %v1029_v0 }
 0x1b5   :  { %v1044_v13 = vmul.f32 %v1028_v4, %v489_v44  ;;  %v465_v14 = vpop.permute.xlu1 %464  ;;  %v463_v16 = vpop.permute.xlu0 %462  ;;  %v1081_v15 = vmul.f32 %v1176_v43, %v1028_v4  ;;  %v508_v52 = vadd.f32 %v507_v35, %v506_v23 }
 0x1b6   :  { %v486_v25 = vmax.f32 %v1627_v20, %v465_v14  ;;  %v470_v19 = vsel %vm466_vm2, %v463_v16, %v465_v14  ;;  %v493_v20 = vld [vmem:[%s1772_s3 + $0x30] sm:$0x7]  ;;  %v1053_v37 = vsel %vm503_vm3, %v1045_v11, 0.0  ;;  %v1090_v51 = vsel %vm503_vm3, %v1082_v29, 0.0 }
 0x1b7   :  { %v485_v34 = vmax.f32 %v1625_v12, %v470_v19  ;;  %v1052_v38 = vadd.f32 %v1051_v21, %v1044_v13  ;;  %v1089_v45 = vadd.f32 %v1088_v31, %v1081_v15  ;;  %v1040_v15 = vld [vmem:[%s1772_s3 + $0x30] sm:$0x7] }
 0x1b8   :  { %v543_v12 = vmul.f32 %v1181_v30, %v486_v25  ;;  %v502_v44 = vmul.f32 %v494_v33, %v486_v25  ;;  %v1239_v25 = vld [vmem:[%s1772_s3 + $0x70] sm:$0x7] }
 0x1b9   :  { %v461_v41 = vpop.permute.xlu1 %460  ;;  %v459_v42 = vpop.permute.xlu0 %458  ;;  %v501_v55 = vmul.f32 %v493_v20, %v485_v34  ;;  %v542_v57 = vmul.f32 %v1180_v46, %v485_v34  ;;  %v1054_v60 = vadd.f32 %v1053_v37, %v1052_v38  ;;  %v1091_v2 = vadd.f32 %v1090_v51, %v1089_v45 }
 0x1ba   :  { %v484_v47 = vmax.f32 %v1609_v24, %v461_v41  ;;  %v469_v50 = vsel %vm466_vm2, %v459_v42, %v461_v41  ;;  %v548_v24 = vadd.f32 %v547_v36, %v546_v32  ;;  %v554_v62 = vsel %vm515_vm4, %v543_v12, 0.0 }
 0x1bb   :  { %v483_v53 = vmax.f32 %v1612_v27, %v469_v50  ;;  %v516_v5 = vsel %vm515_vm4, %v502_v44, 0.0  ;;  %v552_v21 = vsel %vm512_vm5, %v542_v57, 0.0  ;;  %v513_v23 = vsel %vm512_vm5, %v501_v55, 0.0 }
 0x1bc   :  { %v500_v43 = vmul.f32 %v492_v39, %v484_v47  ;;  %v541_v56 = vmul.f32 %v1179_v40, %v484_v47 }
 0x1bd   :  { %v499_v58 = vmul.f32 %v491_v48, %v483_v53  ;;  %v540_v59 = vmul.f32 %v1178_v49, %v483_v53  ;;  %v1009_v63 = vpop.permute.xlu1 %1008  ;;  %v1007_v61 = vpop.permute.xlu0 %1006 }
 0x1be   :  { %v1031_v0 = vmax.f32 %v1618_v18, %v1009_v63  ;;  %v1016_v3 = vsel %vm466_vm2, %v1007_v61, %v1009_v63  ;;  %v510_v6 = vsel %vm503_vm3, %v500_v43, 0.0  ;;  %v550_v7 = vsel %vm503_vm3, %v541_v56, 0.0  ;;  %v1041_v18 = vld [vmem:[%s1772_s3 + $0x38] sm:$0x7] }
 0x1bf   :  { %v509_v1 = vadd.f32 %v508_v52, %v499_v58  ;;  %v549_v4 = vadd.f32 %v548_v24, %v540_v59  ;;  %v1030_v27 = vmax.f32 %v1620_v22, %v1016_v3 }
 0x1c0   :  { %v1047_v8 = vmul.f32 %v1031_v0, %v492_v39  ;;  %v1084_v9 = vmul.f32 %v1179_v40, %v1031_v0  ;;  %v1240_v39 = vld [vmem:[%s1772_s3 + $0x78] sm:$0x7] }
 0x1c1   :  { %v1046_v10 = vmul.f32 %v1030_v27, %v491_v48  ;;  %v1083_v11 = vmul.f32 %v1178_v49, %v1030_v27  ;;  %v1013_v13 = vpop.permute.xlu1 %1012  ;;  %v1011_v14 = vpop.permute.xlu0 %1010  ;;  %v551_v16 = vadd.f32 %v550_v7, %v549_v4  ;;  %v511_v17 = vadd.f32 %v510_v6, %v509_v1 }
 0x1c2   :  { %v1033_v22 = vmax.f32 %v1643_v28, %v1013_v13  ;;  %v1017_v19 = vsel %vm466_vm2, %v1011_v14, %v1013_v13  ;;  %v1056_v28 = vsel %vm503_vm3, %v1047_v8, 0.0  ;;  %v1093_v33 = vsel %vm503_vm3, %v1084_v9, 0.0  ;;  %v569_v14 = vld [vmem:[%s1773_s4] sm:$0x1] }
 0x1c3   :  { %v1055_v29 = vadd.f32 %v1054_v60, %v1046_v10  ;;  %v1092_v30 = vadd.f32 %v1091_v2, %v1083_v11  ;;  %v1032_v31 = vmax.f32 %v1641_v26, %v1017_v19  ;;  %v553_v32 = vadd.f32 %v552_v21, %v551_v16 }
 0x1c4   :  { %v1049_v20 = vmul.f32 %v1041_v18, %v1033_v22  ;;  %v514_v34 = vadd.f32 %v513_v23, %v511_v17  ;;  %v1086_v12 = vmul.f32 %v1240_v39, %v1033_v22  ;;  %v23_v18 = vand.u32 127, %v22_v54  ;;  %v1111_v54 = vld [vmem:[%s1773_s4] sm:$0x1] }
 0x1c5   :  { %v1048_v35 = vmul.f32 %v1040_v15, %v1032_v31  ;;  %v1085_v36 = vmul.f32 %v1239_v25, %v1032_v31  ;;  %v555_v37 = vadd.f32 %v554_v62, %v553_v32  ;;  %v1057_v38 = vadd.f32 %v1056_v28, %v1055_v29 }
 0x1c6   :  { %v517_v40 = vadd.f32 %v516_v5, %v514_v34  ;;  %v1094_v41 = vadd.f32 %v1093_v33, %v1092_v30  ;;  %v1060_v46 = vsel %vm515_vm4, %v1049_v20, 0.0  ;;  %v1097_v49 = vsel %vm515_vm4, %v1086_v12, 0.0 }
 0x1c7   :  { %556 = vadd.xlane.f32.xlu1 %v555_v37  ;;  %v1058_v26 = vsel %vm512_vm5, %v1048_v35, 0.0  ;;  %v1095_v42 = vsel %vm512_vm5, %v1085_v36, 0.0  ;;  %vm565_vm6 = vcmp.eq.s32.totalorder %v23_v18, 0 }
 0x1c8   :  { %518 = vadd.xlane.f32.xlu0 %v517_v40  ;;  %v1059_v45 = vadd.f32 %v1058_v26, %v1057_v38  ;;  %v1096_v48 = vadd.f32 %v1095_v42, %v1094_v41 }
 0x1ca   :  { %v1061_v47 = vadd.f32 %v1060_v46, %v1059_v45  ;;  %v1098_v50 = vadd.f32 %v1097_v49, %v1096_v48 }
 0x1cc   :  { %1062 = vadd.xlane.f32.xlu0 %v1061_v47 }
 0x1d0   :  { %1099 = vadd.xlane.f32.xlu0 %v1098_v50 }
 0x254   :  { %v557_v51 = vpop.xlane.xlu1 %556 }
 0x255   :  { %v558_v44 = vrot.slane %v557_v51, 4  ;;  %v519_v52 = vpop.xlane.xlu0 %518 }
 0x256   :  { %v520_v53 = vrot.slane %v519_v52, 4 }
 0x257   :  { %v559_v55 = vadd.f32 %v558_v44, %v557_v51 }
 0x258   :  { %v521_v43 = vadd.f32 %v520_v53, %v519_v52 }
 0x259   :  { %v560_v56 = vrot.slane %v559_v55, 2  ;;  %v1063_v24 = vpop.xlane.xlu0 %1062 }
 0x25a   :  { %v522_v57 = vrot.slane %v521_v43, 2  ;;  %v1064_v58 = vrot.slane %v1063_v24, 4 }
 0x25b   :  { %v561_v59 = vadd.f32 %v560_v56, %v559_v55 }
 0x25c   :  { %v1065_v63 = vadd.f32 %v1064_v58, %v1063_v24  ;;  %v523_v60 = vadd.f32 %v522_v57, %v521_v43 }
 0x25d   :  { %v1100_v61 = vpop.xlane.xlu0 %1099  ;;  %v562_v0 = vrot.slane %v561_v59, 1 }
 0x25e   :  { %v1066_v2 = vrot.slane %v1065_v63, 2  ;;  %v1101_v3 = vrot.slane %v1100_v61, 4  ;;  %v524_v62 = vrot.slane %v523_v60, 1 }
 0x25f   :  { %v563_v1 = vadd.f32 %v562_v0, %v561_v59 }
 0x260   :  { %v1102_v4 = vadd.f32 %v1101_v3, %v1100_v61  ;;  %v525_v27 = vadd.f32 %v524_v62, %v523_v60  ;;  %v1067_v5 = vadd.f32 %v1066_v2, %v1065_v63 }
 0x262   :  { %v1103_v6 = vrot.slane %v1102_v4, 2  ;;  %1273 = vpush %v525_v27  ;;  %v1068_v7 = vrot.slane %v1067_v5, 1 }
 0x263   :  { %1275 = vpush %v563_v1 }
 0x264   :  { %v1104_v8 = vadd.f32 %v1103_v6, %v1102_v4  ;;  %v1069_v9 = vadd.f32 %v1068_v7, %v1067_v5 }
 0x266   :  { %1277 = vpush %v1069_v9  ;;  %v1105_v10 = vrot.slane %v1104_v8, 1 }
 0x268   :  { %v1106_v11 = vadd.f32 %v1105_v10, %v1104_v8 }
 0x26a   :  { %1279 = vpush %v1106_v11 }
 0x293   :  { %s1274_s3 = spop %1273 }
 0x294   :  { %v566_v13 = vstv %s1274_s3  ;;  %s1276_s25 = spop %1275 }
 0x295   :  { %v567_v16 = vstv %s1276_s25 }
 0x296   :  { %v568_v17 = vsel %vm565_vm6, %v566_v13, %v567_v16 }
 0x297   :  { %v570_v22 = vadd.f32 %v569_v14, %v568_v17  ;;  %s1278_s28 = spop %1277 }
 0x298   :  { %v1108_v15 = vstv %s1278_s28 }
 0x299   :  { %572 = vst.msk [vmem:[#allocation2] sm:$0x1] %vm571_vm7, %v570_v22 }
 0x29b   :  { %s1280_s29 = spop %1279 }
 0x29c   :  { %v1109_v25 = vstv %s1280_s29 }
 0x29d   :  { %v1110_v19 = vsel %vm565_vm6, %v1108_v15, %v1109_v25 }
 0x29e   :  { %v1112_v21 = vadd.f32 %v1111_v54, %v1110_v19 }
 0x2a0   :  { %1114 = vst.msk [vmem:[#allocation2 + $0x1] sm:$0x1] %vm571_vm7, %v1112_v21 }
 0x2a1   :  { %1365 = shalt.err (!%p1362_p4)
}
 0x2a2   :  { %s1366_s4 = scalar_lea.hbm %s1774_s5, 32 }
 0x2a3   :  { %p1367_p5 = scmp.ne.s32.totalorder %s1774_s5, %s1366_s4  ;;  %p1370_p6 = scmp.lt.u32.totalorder %s1366_s4, %s1774_s5 }
 0x2a5   :  { %p1372_p7 = pnand %p1370_p6, %p1367_p5 }
 0x2a7   :  { %1375 = shalt.err (!%p1372_p7)
}
 0x2a8   :  { %s1381_s2 = smov 16   ;;  %s1382_s15 = smov 1  }
 0x2a9   :  { %1126 = dma.vmem_to_hbm [thread:$0]  %s1121_s8, 32, %s1774_s5, [#allocation3], %s1381_s2, %s1381_s2, %s1382_s15  }
 0x2aa   :  { %1376 = dma.done.wait [#allocation3], 32  }
 0x2ab   :  { %1377 = vsyncadd [#allocation3], 4294967264 }
 0x2ac   :  { %1130 = vsyncpa [#allocation3], 1 }

</bundles_post_ra>
